<compile_context>
chip_gen: v5e
topology: v5e:2x2
jax: 0.10.0
libtpu: 0.0.40
codegen_flags: <defaults>
</compile_context>

<pallas_src>
import functools

import jax
import jax.numpy as jnp
from jax import lax
from jax.experimental import pallas as pl
from jax.experimental.pallas import tpu as pltpu


def _leaky_relu(x, alpha=0.2):
    return jnp.where(x >= 0, x, alpha * x)


# --------------------------------------------------------------------------
# Kernel
# --------------------------------------------------------------------------
def dgraph_kernel(gamma_ref, x_ref, w1a_ref, w1b_ref, b1_ref, w2_ref, b2_ref,
                  o_ref, m_ref, obuf_ref, *, tile_n):
    bblk, _, n_nodes = x_ref.shape
    n_tiles = n_nodes // tile_n
    gamma = gamma_ref[0, 0]                      # fp32 scalar from SMEM
    mm = x_ref.dtype                             # matmul dtype (bf16 or f32)

    w1a = w1a_ref[...]                           # (N, C)
    w1b = w1b_ref[...]                           # (N, C)
    b1 = b1_ref[...]                             # (N, 1)  fp32
    w2 = w2_ref[...]                             # (F, C)
    b2 = b2_ref[...]                             # (F, 1)  fp32
    # Hoisted: gamma-independent part of the folded adjacency weight.
    base = w1a.astype(jnp.float32) + w1b.astype(jnp.float32)        # (N, C)

    def batch_body(b, carry):
        xb = x_ref[b]                            # (C, N), matmul dtype

        # ---- channel self-attention folded into the adjacency weight -------
        # M = w1a + w1b + gamma * (w1a @ att);  skipped entirely when gamma==0.
        @pl.when(gamma == 0.0)
        def _():
            m_ref[...] = base

        @pl.when(gamma != 0.0)
        def _():
            energy = lax.dot_general(            # x @ x^T without a transpose
                xb, xb, (((1,), (1,)), ((), ())),
                preferred_element_type=jnp.float32)                 # (C, C)
            # softmax(rowmax(E) - E) == softmax(-E); stable single-pass form.
            p = jnp.exp(jnp.min(energy, axis=-1, keepdims=True) - energy)
            att = p / jnp.sum(p, axis=-1, keepdims=True)            # (C, C)
            m_ref[...] = base + jnp.dot(w1a, (gamma * att).astype(mm),
                                        preferred_element_type=jnp.float32)

        m_fold = m_ref[...].astype(mm)           # (N, C), tile-invariant

        # ---- adjacency / propagation / dynamic weight, per column tile -----
        for t in range(n_tiles):                 # static, lane-aligned offsets
            sl = slice(t * tile_n, (t + 1) * tile_n)
            xc = xb if n_tiles == 1 else xb[:, sl]                  # (C, Tn)

            pre = jnp.dot(m_fold, xc,
                          preferred_element_type=jnp.float32) + b1  # (N, Tn)
            adj = 0.5 * jnp.tanh(0.5 * pre) + 0.5   # sigmoid, single EUP push

            y = _leaky_relu(jnp.dot(xb, adj.astype(mm),
                                    preferred_element_type=jnp.float32))
            o = _leaky_relu(jnp.dot(w2, y.astype(mm),
                                    preferred_element_type=jnp.float32) + b2)

            if n_tiles == 1:
                o_ref[b] = o.astype(o_ref.dtype)
            else:
                obuf_ref[:, sl] = o.astype(obuf_ref.dtype)

        if n_tiles > 1:                          # one lane-dense (F, N) store
            o_ref[b] = obuf_ref[...]
        return carry

    if bblk == 1:
        batch_body(0, None)
    else:
        lax.fori_loop(0, bblk, batch_body, None)


# --------------------------------------------------------------------------
# Generation-aware tile / VMEM selection
# --------------------------------------------------------------------------
def _round_up(v, m):
    return ((v + m - 1) // m) * m


def _vmem_capacity_bytes():
    try:
        info = pltpu.get_tpu_info()
        cap = int(getattr(info, "vmem_capacity_bytes", 0))
        if cap > 0:
            return cap
    except Exception:
        pass
    return 64 * 1024 * 1024          # conservative fallback (v7x per-core VMEM)


def _tn_candidates(n):
    if n % 128 != 0:
        return [n]                   # cannot tile cleanly; keep full width
    return [n] + [t for t in (4096, 2048, 1024, 512, 256, 128)
                  if t < n and n % t == 0]


def _bblk_candidates(batch):
    divs = [d for d in (8, 4, 2, 1) if batch % d == 0]
    # Prefer leaving >= 2 grid steps so both v7x TensorCores get work.
    pref = [d for d in divs if batch // d >= 2]
    return pref + [d for d in divs if d not in pref]


def _vmem_estimate(bblk, tn, c, n, f, mm_size, out_size):
    """Rough but honest VMEM bound: double-buffered blocks + weights +
    scratch + the fp32 intermediates that are live inside one tile step."""
    s, l = 8, 128
    cs, cl = _round_up(c, s), _round_up(c, l)
    ns, nl = _round_up(n, s), _round_up(n, l)
    fs = _round_up(f, s)
    tl = _round_up(tn, l)
    est = 0
    est += 2 * bblk * cs * nl * mm_size          # x block (double buffered)
    est += 2 * bblk * fs * nl * out_size         # output block (double buffered)
    est += 2 * 2 * ns * cl * mm_size             # w1a, w1b
    est += 2 * ns * l * 4                        # b1 (N,1) lane-padded
    est += 2 * fs * cl * mm_size                 # w2
    est += 2 * fs * l * 4                        # b2
    est += ns * cl * 4                           # M scratch (fp32)
    est += fs * nl * out_size                    # output staging scratch
    est += 3 * cs * cl * 4                       # energy / softmax temporaries
    est += ns * cl * mm_size                     # M cast for the MXU
    est += (2 * 4 + mm_size) * ns * tl           # pre / adj (fp32) + adj (mm)
    est += (4 + mm_size) * cs * tl               # y (fp32 + mm copy)
    return est


def _pick_tiles(batch, c, n, f, mm_size, out_size, budget):
    tcands = _tn_candidates(n)
    bcands = _bblk_candidates(batch)
    for tn in tcands:                            # biggest tile that fits
        for bblk in bcands:
            if _vmem_estimate(bblk, tn, c, n, f, mm_size, out_size) <= budget:
                return bblk, tn
    return 1, tcands[-1]


# --------------------------------------------------------------------------
# Wrapper
# --------------------------------------------------------------------------
def dgraph_forward(x, params, *, matmul_dtype=jnp.bfloat16,
                   vmem_budget_bytes=None):
    B, C, N = x.shape
    F_out = params["w2"].shape[0]
    out_dtype = x.dtype
    mm = jnp.dtype(matmul_dtype)

    gamma = params["gamma"].reshape(1, 1).astype(jnp.float32)
    w1 = params["w1"]                                  # (N, 2C)
    w1a = w1[:, :C].astype(mm)                         # (N, C)
    w1b = w1[:, C:].astype(mm)                         # (N, C)
    b1 = params["b1"].reshape(N, 1).astype(jnp.float32)
    w2 = params["w2"].astype(mm)                       # (F, C)
    b2 = params["b2"].reshape(F_out, 1).astype(jnp.float32)
    x_mm = x.astype(mm)

    cap = _vmem_capacity_bytes()
    vmem_limit = int(cap * 3 // 4)                     # headroom for compiler
    budget = (vmem_budget_bytes if vmem_budget_bytes is not None
              else int(vmem_limit * 9 // 10))
    bblk, tn = _pick_tiles(B, C, N, F_out, mm.itemsize,
                           jnp.dtype(out_dtype).itemsize, budget)
    grid = (B // bblk,)

    kernel = functools.partial(dgraph_kernel, tile_n=tn)

    # NOTE: weights/biases/x use grid-invariant index_maps, so they are DMA'd
    # only when their block index changes (weights: once; x: once per step).
    return pl.pallas_call(
        kernel,
        out_shape=jax.ShapeDtypeStruct((B, F_out, N), out_dtype),
        grid_spec=pltpu.PrefetchScalarGridSpec(
            num_scalar_prefetch=0,
            grid=grid,
            in_specs=[
                pl.BlockSpec(memory_space=pltpu.MemorySpace.SMEM),   # gamma
                pl.BlockSpec((bblk, C, N), lambda bb: (bb, 0, 0)),   # x
                pl.BlockSpec((N, C), lambda bb: (0, 0)),             # w1a
                pl.BlockSpec((N, C), lambda bb: (0, 0)),             # w1b
                pl.BlockSpec((N, 1), lambda bb: (0, 0)),             # b1
                pl.BlockSpec((F_out, C), lambda bb: (0, 0)),         # w2
                pl.BlockSpec((F_out, 1), lambda bb: (0, 0)),         # b2
            ],
            out_specs=pl.BlockSpec((bblk, F_out, N), lambda bb: (bb, 0, 0)),
            scratch_shapes=[
                pltpu.VMEM((N, C), jnp.float32),        # folded adjacency wgt
                pltpu.VMEM((F_out, N), out_dtype),      # output staging buffer
            ],
        ),
        compiler_params=pltpu.CompilerParams(
            dimension_semantics=("parallel",),
            vmem_limit_bytes=vmem_limit),
    )(gamma, x_mm, w1a, w1b, b1, w2, b2)


# --------------------------------------------------------------------------
# Pure-JAX reference (mirrors the PyTorch module exactly, fp32)
# --------------------------------------------------------------------------
def dgraph_reference(x, params):
    gamma = params["gamma"]
    w1, b1 = params["w1"], params["b1"]
    w2, b2 = params["w2"], params["b2"]

    energy = jnp.einsum("bcn,bdn->bcd", x, x)
    e_new = jnp.max(energy, axis=-1, keepdims=True) - energy
    att = jax.nn.softmax(e_new, axis=-1)
    out = jnp.einsum("bcd,bdn->bcn", att, x)
    x_glb = gamma * out + x
    x_cat = jnp.concatenate([x_glb, x], axis=1)                      # (B, 2C, N)
    adj = jax.nn.sigmoid(
        jnp.einsum("oc,bcn->bon", w1, x_cat) + b1[None, :, None])    # (B, N, N)
    y = jnp.matmul(x, adj)                                           # (B, C, N)
    y = jnp.where(y >= 0, y, 0.2 * y)
    o = jnp.einsum("fc,bcn->bfn", w2, y) + b2[None, :, None]
    o = jnp.where(o >= 0, o, 0.2 * o)
    return o


def init_params(key, in_features, out_features, num_nodes):
    k1, k2, k3, k4 = jax.random.split(key, 4)
    scale1 = 1.0 / jnp.sqrt(2.0 * in_features)
    scale2 = 1.0 / jnp.sqrt(1.0 * in_features)
    return {
        # Conv1d(2C, N, 1): weight (N, 2C), bias (N,)
        "w1": jax.random.uniform(k1, (num_nodes, 2 * in_features),
                                 jnp.float32, -scale1, scale1),
        "b1": jax.random.uniform(k2, (num_nodes,), jnp.float32,
                                 -scale1, scale1),
        # Conv1d(C, F, 1): weight (F, C), bias (F,)
        "w2": jax.random.uniform(k3, (out_features, in_features),
                                 jnp.float32, -scale2, scale2),
        "b2": jax.random.uniform(k4, (out_features,), jnp.float32,
                                 -scale2, scale2),
        # nn.Parameter(torch.zeros(1))
        "gamma": jnp.zeros((1,), jnp.float32),
    }


if __name__ == "__main__":
    k_main, k_t4, k_t5 = jax.random.split(jax.random.PRNGKey(0), 3)

    def _rel_err(a, b):
        a32 = a.astype(jnp.float32)
        b32 = b.astype(jnp.float32)
        return float(jnp.linalg.norm(a32 - b32) / (jnp.linalg.norm(b32) + 1e-30))

    # ---- small shape (batch, in_features, out_features, num_nodes) ---------
    B, C, F_out, N = 2, 16, 32, 16
    kx, kp = jax.random.split(k_main)
    x = jax.random.normal(kx, (B, C, N), jnp.float32)
    params = init_params(kp, C, F_out, N)            # gamma == 0, as in torch

    # 1) exact-precision path, gamma == 0 (attention branch skipped at runtime)
    out_fp32 = jax.block_until_ready(
        dgraph_forward(x, params, matmul_dtype=jnp.float32))
    ref = dgraph_reference(x, params)
    assert out_fp32.shape == (B, F_out, N)
    assert jnp.allclose(out_fp32, ref, atol=5e-4, rtol=5e-4), "fp32 mismatch"

    # 2) fp32, non-zero gamma (attention + folded adjacency weight exercised)
    params_g = dict(params, gamma=jnp.array([0.25], jnp.float32))
    out_fp32_g = jax.block_until_ready(
        dgraph_forward(x, params_g, matmul_dtype=jnp.float32))
    ref_g = dgraph_reference(x, params_g)
    assert jnp.allclose(out_fp32_g, ref_g, atol=2e-3, rtol=2e-3), \
        "fp32 (gamma!=0) mismatch"

    # 3) default fast path: bf16 MXU operands, fp32 accumulation (looser tol)
    out_bf16 = jax.block_until_ready(dgraph_forward(x, params_g))
    assert out_bf16.shape == (B, F_out, N)
    assert jnp.allclose(out_bf16, ref_g, atol=1.5e-1, rtol=1e-1), "bf16 mismatch"

    # 4) multi-batch-block path (bblk > 1, fori_loop over batch elements)
    B2, C2, F2, N2 = 8, 16, 32, 256
    kx2, kp2 = jax.random.split(k_t4)
    x2 = jax.random.normal(kx2, (B2, C2, N2), jnp.float32)
    p2 = dict(init_params(kp2, C2, F2, N2), gamma=jnp.array([0.25], jnp.float32))
    out2 = jax.block_until_ready(dgraph_forward(x2, p2, matmul_dtype=jnp.float32))
    assert out2.shape == (B2, F2, N2)
    assert _rel_err(out2, dgraph_reference(x2, p2)) < 1e-2, \
        "multi-batch-block mismatch"

    # 5) in-kernel column-tiled path (forced small VMEM budget -> n_tiles > 1)
    B3, C3, F3, N3 = 2, 32, 64, 1024
    kx3, kp3 = jax.random.split(k_t5)
    x3 = jax.random.normal(kx3, (B3, C3, N3), jnp.float32)
    p3 = dict(init_params(kp3, C3, F3, N3), gamma=jnp.array([0.25], jnp.float32))
    out3 = jax.block_until_ready(
        dgraph_forward(x3, p3, matmul_dtype=jnp.float32,
                       vmem_budget_bytes=8 * 1024 * 1024))
    assert out3.shape == (B3, F3, N3)
    assert _rel_err(out3, dgraph_reference(x3, p3)) < 1e-2, \
        "column-tiled mismatch"

    print("KERNEL_OK")
</pallas_src>

<mosaic_0001>
module attributes {stable_mosaic.version = 11 : i64} {
  func.func @dgraph_kernel(%arg0: i32, %arg1: memref<1x1xf32, #tpu.memory_space<smem>>, %arg2: memref<1x16x16xf32, #tpu.memory_space<vmem>>, %arg3: memref<16x16xf32, #tpu.memory_space<vmem>>, %arg4: memref<16x16xf32, #tpu.memory_space<vmem>>, %arg5: memref<16x1xf32, #tpu.memory_space<vmem>>, %arg6: memref<32x16xf32, #tpu.memory_space<vmem>>, %arg7: memref<32x1xf32, #tpu.memory_space<vmem>>, %arg8: memref<1x32x16xf32, #tpu.memory_space<vmem>>, %arg9: memref<16x16xf32, #tpu.memory_space<vmem>>, %arg10: memref<32x16xf32, #tpu.memory_space<vmem>>) attributes {dimension_semantics = [#tpu.dimension_semantics<parallel>], iteration_bounds = array<i64: 2>, scalar_prefetch = 0 : i64, scratch_operands = 2 : i64, tpu.core_type = #tpu.core_type<tc>, window_params = [{transform_indices = @transform_0, window_bounds = array<i64: 1, 1>}, {transform_indices = @transform_1, window_bounds = array<i64: 1, 16, 16>}, {pipeline_mode = #tpu.pipeline_mode<synchronous>, transform_indices = @transform_2, window_bounds = array<i64: 16, 16>}, {pipeline_mode = #tpu.pipeline_mode<synchronous>, transform_indices = @transform_3, window_bounds = array<i64: 16, 16>}, {pipeline_mode = #tpu.pipeline_mode<synchronous>, transform_indices = @transform_4, window_bounds = array<i64: 16, 1>}, {pipeline_mode = #tpu.pipeline_mode<synchronous>, transform_indices = @transform_5, window_bounds = array<i64: 32, 16>}, {pipeline_mode = #tpu.pipeline_mode<synchronous>, transform_indices = @transform_6, window_bounds = array<i64: 32, 1>}, {transform_indices = @transform_7, window_bounds = array<i64: 1, 32, 16>}]} {
    %c0 = arith.constant 0 : index
    %c0_0 = arith.constant 0 : index
    %0 = memref.load %arg1[%c0, %c0_0] : memref<1x1xf32, #tpu.memory_space<smem>>
    %c0_1 = arith.constant 0 : index
    %c0_2 = arith.constant 0 : index
    %1 = vector.load %arg3[%c0_1, %c0_2] : memref<16x16xf32, #tpu.memory_space<vmem>>, vector<16x16xf32>
    %c0_3 = arith.constant 0 : index
    %c0_4 = arith.constant 0 : index
    %2 = vector.load %arg4[%c0_3, %c0_4] : memref<16x16xf32, #tpu.memory_space<vmem>>, vector<16x16xf32>
    %c0_5 = arith.constant 0 : index
    %c0_6 = arith.constant 0 : index
    %3 = vector.load %arg5[%c0_5, %c0_6] : memref<16x1xf32, #tpu.memory_space<vmem>>, vector<16x1xf32>
    %c0_7 = arith.constant 0 : index
    %c0_8 = arith.constant 0 : index
    %4 = vector.load %arg6[%c0_7, %c0_8] : memref<32x16xf32, #tpu.memory_space<vmem>>, vector<32x16xf32>
    %c0_9 = arith.constant 0 : index
    %c0_10 = arith.constant 0 : index
    %5 = vector.load %arg7[%c0_9, %c0_10] : memref<32x1xf32, #tpu.memory_space<vmem>>, vector<32x1xf32>
    %6 = arith.addf %1, %2 : vector<16x16xf32>
    %c0_11 = arith.constant 0 : index
    %c0_12 = arith.constant 0 : index
    %c0_13 = arith.constant 0 : index
    %7 = vector.load %arg2[%c0_11, %c0_12, %c0_13] : memref<1x16x16xf32, #tpu.memory_space<vmem>>, vector<1x16x16xf32>
    %8 = vector.shape_cast %7 : vector<1x16x16xf32> to vector<16x16xf32>
    %cst = arith.constant 0.000000e+00 : f32
    %9 = arith.cmpf oeq, %0, %cst : f32
    %10 = arith.extui %9 : i1 to i32
    %c0_i32 = arith.constant 0 : i32
    %11 = arith.cmpi ne, %10, %c0_i32 : i32
    scf.if %11 {
      %c0_31 = arith.constant 0 : index
      %c0_32 = arith.constant 0 : index
      %43 = vector.load %arg9[%c0_31, %c0_32] : memref<16x16xf32, #tpu.memory_space<vmem>>, vector<16x16xf32>
      tpu.vector_store %arg9[%c0_31, %c0_32], %6 {strides = array<i32>} : memref<16x16xf32, #tpu.memory_space<vmem>>, vector<16x16xf32>,
    } else {
    }
    %cst_14 = arith.constant 0.000000e+00 : f32
    %12 = arith.cmpf one, %0, %cst_14 : f32
    %13 = arith.extui %12 : i1 to i32
    %c0_i32_15 = arith.constant 0 : i32
    %14 = arith.cmpi ne, %13, %c0_i32_15 : i32
    scf.if %14 {
      %cst_31 = arith.constant dense<0.000000e+00> : vector<16x16xf32>
      %43 = tpu.matmul %8, %8, %cst_31 {dimension_numbers = #tpu.dot_dimension_numbers<[1], [1], [0], [0], [0, 0, 1, 0], [], []>} : vector<16x16xf32>, vector<16x16xf32>, vector<16x16xf32> -> vector<16x16xf32>
      %cst_32 = arith.constant dense<0x7F800000> : vector<16xf32>
      %44 = vector.multi_reduction <minimumf>, %43, %cst_32 [1] : vector<16x16xf32> to vector<16xf32>
      %45 = vector.shape_cast %44 : vector<16xf32> to vector<16x1xf32>
      %46 = vector.broadcast %45 : vector<16x1xf32> to vector<16x16xf32>
      %47 = arith.subf %46, %43 : vector<16x16xf32>
      %48 = math.exp %47 : vector<16x16xf32>
      %cst_33 = arith.constant dense<0.000000e+00> : vector<16xf32>
      %49 = vector.multi_reduction <add>, %48, %cst_33 [1] : vector<16x16xf32> to vector<16xf32>
      %50 = vector.shape_cast %49 : vector<16xf32> to vector<16x1xf32>
      %51 = vector.broadcast %50 : vector<16x1xf32> to vector<16x16xf32>
      %52 = arith.divf %48, %51 : vector<16x16xf32>
      %53 = vector.broadcast %0 : f32 to vector<16x16xf32>
      %54 = arith.mulf %53, %52 : vector<16x16xf32>
      %cst_34 = arith.constant dense<0.000000e+00> : vector<16x16xf32>
      %55 = tpu.matmul %1, %54, %cst_34 {dimension_numbers = #tpu.dot_dimension_numbers<[1], [0], [0], [1], [0, 0, 1, 1], [], []>} : vector<16x16xf32>, vector<16x16xf32>, vector<16x16xf32> -> vector<16x16xf32>
      %56 = arith.addf %6, %55 : vector<16x16xf32>
      %c0_35 = arith.constant 0 : index
      %c0_36 = arith.constant 0 : index
      %57 = vector.load %arg9[%c0_35, %c0_36] : memref<16x16xf32, #tpu.memory_space<vmem>>, vector<16x16xf32>
      tpu.vector_store %arg9[%c0_35, %c0_36], %56 {strides = array<i32>} : memref<16x16xf32, #tpu.memory_space<vmem>>, vector<16x16xf32>,
    } else {
    }
    %c0_16 = arith.constant 0 : index
    %c0_17 = arith.constant 0 : index
    %15 = vector.load %arg9[%c0_16, %c0_17] : memref<16x16xf32, #tpu.memory_space<vmem>>, vector<16x16xf32>
    %cst_18 = arith.constant dense<0.000000e+00> : vector<16x16xf32>
    %16 = tpu.matmul %15, %8, %cst_18 {dimension_numbers = #tpu.dot_dimension_numbers<[1], [0], [0], [1], [0, 0, 1, 1], [], []>} : vector<16x16xf32>, vector<16x16xf32>, vector<16x16xf32> -> vector<16x16xf32>
    %17 = vector.broadcast %3 : vector<16x1xf32> to vector<16x16xf32>
    %18 = arith.addf %16, %17 : vector<16x16xf32>
    %cst_19 = arith.constant 5.000000e-01 : f32
    %19 = vector.broadcast %cst_19 : f32 to vector<16x16xf32>
    %20 = arith.mulf %19, %18 : vector<16x16xf32>
    %21 = math.tanh %20 : vector<16x16xf32>
    %cst_20 = arith.constant 5.000000e-01 : f32
    %22 = vector.broadcast %cst_20 : f32 to vector<16x16xf32>
    %23 = arith.mulf %22, %21 : vector<16x16xf32>
    %cst_21 = arith.constant 5.000000e-01 : f32
    %24 = vector.broadcast %cst_21 : f32 to vector<16x16xf32>
    %25 = arith.addf %23, %24 : vector<16x16xf32>
    %cst_22 = arith.constant dense<0.000000e+00> : vector<16x16xf32>
    %26 = tpu.matmul %8, %25, %cst_22 {dimension_numbers = #tpu.dot_dimension_numbers<[1], [0], [0], [1], [0, 0, 1, 1], [], []>} : vector<16x16xf32>, vector<16x16xf32>, vector<16x16xf32> -> vector<16x16xf32>
    %cst_23 = arith.constant 0.000000e+00 : f32
    %27 = vector.broadcast %cst_23 : f32 to vector<16x16xf32>
    %28 = arith.cmpf oge, %26, %27 : vector<16x16xf32>
    %cst_24 = arith.constant 2.000000e-01 : f32
    %29 = vector.broadcast %cst_24 : f32 to vector<16x16xf32>
    %30 = arith.mulf %29, %26 : vector<16x16xf32>
    %31 = arith.select %28, %26, %30 : vector<16x16xi1>, vector<16x16xf32>
    %cst_25 = arith.constant dense<0.000000e+00> : vector<32x16xf32>
    %32 = tpu.matmul %4, %31, %cst_25 {dimension_numbers = #tpu.dot_dimension_numbers<[1], [0], [0], [1], [0, 0, 1, 1], [], []>} : vector<32x16xf32>, vector<16x16xf32>, vector<32x16xf32> -> vector<32x16xf32>
    %33 = vector.broadcast %5 : vector<32x1xf32> to vector<32x16xf32>
    %34 = arith.addf %32, %33 : vector<32x16xf32>
    %cst_26 = arith.constant 0.000000e+00 : f32
    %35 = vector.broadcast %cst_26 : f32 to vector<32x16xf32>
    %36 = arith.cmpf oge, %34, %35 : vector<32x16xf32>
    %cst_27 = arith.constant 2.000000e-01 : f32
    %37 = vector.broadcast %cst_27 : f32 to vector<32x16xf32>
    %38 = arith.mulf %37, %34 : vector<32x16xf32>
    %39 = arith.select %36, %34, %38 : vector<32x16xi1>, vector<32x16xf32>
    %c0_28 = arith.constant 0 : index
    %c0_29 = arith.constant 0 : index
    %c0_30 = arith.constant 0 : index
    %40 = vector.load %arg8[%c0_28, %c0_29, %c0_30] : memref<1x32x16xf32, #tpu.memory_space<vmem>>, vector<1x32x16xf32>
    %41 = vector.shape_cast %40 : vector<1x32x16xf32> to vector<32x16xf32>
    %42 = vector.shape_cast %39 : vector<32x16xf32> to vector<1x32x16xf32>
    tpu.vector_store %arg8[%c0_28, %c0_29, %c0_30], %42 {strides = array<i32>} : memref<1x32x16xf32, #tpu.memory_space<vmem>>, vector<1x32x16xf32>,
    return
  }
  func.func @transform_0(%arg0: i32) -> (i32, i32) {
    %c0_i32 = arith.constant 0 : i32
    %c0_i32_0 = arith.constant 0 : i32
    %c0_i32_1 = arith.constant 0 : i32
    return %c0_i32, %c0_i32_0 : i32, i32
  }
  func.func @transform_1(%arg0: i32) -> (i32, i32, i32) {
    %c0_i32 = arith.constant 0 : i32
    %c0_i32_0 = arith.constant 0 : i32
    %c0_i32_1 = arith.constant 0 : i32
    return %arg0, %c0_i32, %c0_i32_0 : i32, i32, i32
  }
  func.func @transform_2(%arg0: i32) -> (i32, i32) {
    %c0_i32 = arith.constant 0 : i32
    %c0_i32_0 = arith.constant 0 : i32
    %c0_i32_1 = arith.constant 0 : i32
    return %c0_i32, %c0_i32_0 : i32, i32
  }
  func.func @transform_3(%arg0: i32) -> (i32, i32) {
    %c0_i32 = arith.constant 0 : i32
    %c0_i32_0 = arith.constant 0 : i32
    %c0_i32_1 = arith.constant 0 : i32
    return %c0_i32, %c0_i32_0 : i32, i32
  }
  func.func @transform_4(%arg0: i32) -> (i32, i32) {
    %c0_i32 = arith.constant 0 : i32
    %c0_i32_0 = arith.constant 0 : i32
    %c0_i32_1 = arith.constant 0 : i32
    return %c0_i32, %c0_i32_0 : i32, i32
  }
  func.func @transform_5(%arg0: i32) -> (i32, i32) {
    %c0_i32 = arith.constant 0 : i32
    %c0_i32_0 = arith.constant 0 : i32
    %c0_i32_1 = arith.constant 0 : i32
    return %c0_i32, %c0_i32_0 : i32, i32
  }
  func.func @transform_6(%arg0: i32) -> (i32, i32) {
    %c0_i32 = arith.constant 0 : i32
    %c0_i32_0 = arith.constant 0 : i32
    %c0_i32_1 = arith.constant 0 : i32
    return %c0_i32, %c0_i32_0 : i32, i32
  }
  func.func @transform_7(%arg0: i32) -> (i32, i32, i32) {
    %c0_i32 = arith.constant 0 : i32
    %c0_i32_0 = arith.constant 0 : i32
    %c0_i32_1 = arith.constant 0 : i32
    return %arg0, %c0_i32, %c0_i32_0 : i32, i32, i32
  }
}

</mosaic_0001>

<bundles_post_ra>
// kernel: tpu_custom_call.1
= control target key start
LH: loop header
LB: loop body
LE: loop exit
PB: predicated region body
PF: predicated region fallthrough
CT: control target
= control target key end

     0   :  { %s750_s26 = smov 0   ;;  %s906_s0 = inlined_call_operand.<no memory space> [shape: f32[1,1], index: 0, kind: input, shape index: {}]   ;;  %s907_s1 = inlined_call_operand.vmem [shape: f32[2,16,16], index: 1, kind: input, shape index: {}]   ;;  %s908_s2 = inlined_call_operand.vmem [shape: f32[16,16], index: 2, kind: input, shape index: {}]   ;;  %s909_s3 = inlined_call_operand.vmem [shape: f32[16,16], index: 3, kind: input, shape index: {}]   ;;  %s910_s4 = inlined_call_operand.vmem [shape: f32[16,1], index: 4, kind: input, shape index: {}]   ;;  %s911_s5 = inlined_call_operand.vmem [shape: f32[32,16], index: 5, kind: input, shape index: {}]   ;;  %s912_s6 = inlined_call_operand.vmem [shape: f32[32,1], index: 6, kind: input, shape index: {}]   ;;  %s913_s7 = inlined_call_operand.vmem [shape: f32[2,32,16], index: 7, kind: output, shape index: {}]  }
   0x1   :  { %12 = sst [smem:[#allocation4]] %s906_s0 }
   0x2 LB: > { %s641_s27 = sadd.s32 4294967295, %s704_s26   ;;  %p645_p0 = scmp.ge.s32.totalorder %s704_s26, 1  ;;  %s704_s26 = sphi %s750_s26, %s18_s26  }
   0x3   : > { %p238_p1 = scmp.lt.s32.totalorder %s704_s26, 3 }
   0x5   : > { %p239_p2 = pnand %p645_p0, %p238_p1 }
   0x6   : > { %p270_p3 = scmp.lt.s32.totalorder (!%p239_p2), %s641_s27, 1  ;;  %s758_s28 = sld [smem:[#allocation4]] (!%p239_p2) }
   0x7   : > { %242 = sbr.rel (%p239_p2) target bundleno = 1013 (0x3f5), region = 48 }
   0xc   : > { %v763_v0 = vld [vmem:[%s908_s2] sm:$0xff]  ;;  %v768_v1 = vld [vmem:[%s908_s2 + $0x8] sm:$0xff]  ;;  %s915_s27 = smov (!%p270_p3, %s641_s27), 1  ;;  %v802_v9 = vld [vmem:[%s911_s5 + $0x10] sm:$0xff]  ;;  %p299_p4 = scmp.eq.f32.partialorder %s758_s28, 0.0 }
   0xd   : > { %v283_v2 = vld [vmem:[%s909_s3] sm:$0xff]  ;;  %v284_v3 = vld [vmem:[%s909_s3 + $0x8] sm:$0xff]  ;;  %v810_v11 = vld [vmem:[%s911_s5 + $0x18] sm:$0xff]  ;;  %s666_s8 = sshll.u32 %s915_s27, 4  ;;  %s667_s9 = sshll.u32 %s915_s27, 5  ;;  %vm303_vm0 = vcmask (%p299_p4), 130048  }
   0xe   : > { %v779_v4 = vld [vmem:[%s910_s4] sm:$0xff]  ;;  %v784_v5 = vld [vmem:[%s910_s4 + $0x8] sm:$0xff]  ;;  %v787_v6 = vadd.f32 %v283_v2, %v763_v0  ;;  %v805_v10 = vadd.f32 %v284_v3, %v768_v1  ;;  %v825_v14 = vld [vmem:[%s912_s6 + $0x10] sm:$0xff]  ;;  %s274_s16 = scalar_lea.vmem %s907_s1, %s666_s8  ;;  %s838_s19 = scalar_lea.vmem %s913_s7, %s667_s9 }
   0xf   : > { %v792_v7 = vld [vmem:[%s911_s5] sm:$0xff]  ;;  %v797_v8 = vld [vmem:[%s911_s5 + $0x8] sm:$0xff]  ;;  %v830_v15 = vld [vmem:[%s912_s6 + $0x18] sm:$0xff]  ;;  %302 = sbr.rel (!%p299_p4) target bundleno = 20 (0x14), region = 52 }
  0x10   : > { %v815_v12 = vld [vmem:[%s912_s6] sm:$0xff]  ;;  %v820_v13 = vld [vmem:[%s912_s6 + $0x8] sm:$0xff]  ;;  %304 = vst.msk [vmem:[#allocation2] sm:$0xff] (%p299_p4), %vm303_vm0, %v787_v6 }
  0x11   : > { %v840_v16 = vld [vmem:[%s274_s16] sm:$0xff]  ;;  %v842_v17 = vld [vmem:[%s274_s16 + $0x8] sm:$0xff]  ;;  %305 = vst.msk [vmem:[#allocation2 + $0x8] sm:$0xff] (%p299_p4), %vm303_vm0, %v805_v10 }
  0x14 PF: > { %p306_p5 = scmp.ne.f32.partialorder %s758_s28, 0.0 }
  0x15   : > { %vm310_vm1 = vcmask (%p306_p5), 130048   ;;  %v388_v46 = vstv (%p306_p5), %s758_s28 }
  0x16   : > { %309 = sbr.rel (!%p306_p5) target bundleno = 571 (0x23b), region = 56  ;;  %668 = vmatpush.xpose.msk.msra.mxu2 (%p306_p5), %vm310_vm1, %v842_v17  ;;  %650 = vmatpush.xpose.msk.msra.mxu0 (%p306_p5), %vm310_vm1, %v842_v17 }
  0x1a   : > { %669 = vmatpush.xpose.msk.msra.mxu2 (%p306_p5), %vm310_vm1, %v840_v16  ;;  %651 = vmatpush.xpose.msk.msra.mxu0 (%p306_p5), %vm310_vm1, %v840_v16 }
  0x1d   : > { %653 = vmatmul.msk.f32.vlgmr.msra.gmra.mxu2 %vm310_vm1, %v842_v17  ;;  %652 = vmatmul.msk.f32.vlgmr.msra.gmra.mxu0 %vm310_vm1, %v840_v16 }
  0x9a   : > { %v334_v20 = vpop.f32.mrf.mxu0 }
  0x9b   : > { %v340_v21 = vsel %vm310_vm1, %v334_v20, inf }
  0xa0   : > { %v337_v18 = vpop.f32.mrf.mxu2 }
  0xa1   : > { %v343_v19 = vsel %vm310_vm1, %v337_v18, inf }
  0xa2   : > { %344 = vmin.xlane.f32.xlu0 %v343_v19 }
  0xaa   : > { %341 = vmin.xlane.f32.xlu0 %v340_v21 }
 0x115   : > { %v345_v22 = vpop.xlane.xlu0 %344 }
 0x116   : > { %v347_v23 = vsub.f32 %v345_v22, %v337_v18 }
 0x118   : > { %v350_v24 = vmul.f32 1.442695, %v347_v23 }
 0x11a   : > { %683 = vpow2.f32 %v350_v24 }
 0x11d   : > { %v342_v25 = vpop.xlane.xlu0 %341 }
 0x11e   : > { %v346_v26 = vsub.f32 %v342_v25, %v334_v20 }
 0x120   : > { %v684_v27 = vpop.eup %683  ;;  %v348_v28 = vmul.f32 1.442695, %v346_v26 }
 0x121   : > { %v355_v29 = vsel %vm310_vm1, %v684_v27, 0.0 }
 0x122   : > { %685 = vpow2.f32 %v348_v28  ;;  %356 = vadd.xlane.f32.xlu1 %v355_v29 }
 0x128   : > { %v686_v30 = vpop.eup %685 }
 0x129   : > { %v352_v31 = vsel %vm310_vm1, %v686_v30, 0.0 }
 0x12a   : > { %353 = vadd.xlane.f32.xlu1 %v352_v31 }
 0x195   : > { %v357_v32 = vpop.xlane.xlu1 %356 }
 0x196   : > { %687 = vrcp.f32 %v357_v32  ;;  %v384_v37 = vand.u32 2147483648, %v357_v32  ;;  %v382_v39 = vand.u32 2147483647, %v357_v32  ;;  %vm378_vm3 = vweird.f32 %v357_v32 }
 0x198   : > { %v385_v42 = vor.u32 1.1754944e-38, %v384_v37  ;;  %vm383_vm5 = vcmp.eq.f32.partialorder %v382_v39, 8.507059e+37 }
 0x19c   : > { %v688_v33 = vpop.eup %687 }
 0x19d   : > { %v374_v34 = vmul.f32 %v688_v33, %v357_v32  ;;  %v354_v35 = vpop.xlane.xlu1 %353  ;;  %vm379_vm2 = vweird.f32 %v688_v33 }
 0x19e   : > { %689 = vrcp.f32 %v354_v35  ;;  %vm380_vm4 = vmor %vm378_vm3, %vm379_vm2  ;;  %v369_v49 = vand.u32 2147483648, %v354_v35  ;;  %v367_v51 = vand.u32 2147483647, %v354_v35  ;;  %vm363_vm7 = vweird.f32 %v354_v35 }
 0x19f   : > { %v375_v36 = vsub.f32 1.0, %v374_v34 }
 0x1a0   : > { %v370_v54 = vor.u32 1.1754944e-38, %v369_v49  ;;  %vm368_vm9 = vcmp.eq.f32.partialorder %v367_v51, 8.507059e+37 }
 0x1a1   : > { %v376_v38 = vmul.f32 %v688_v33, %v375_v36 }
 0x1a3   : > { %v377_v40 = vadd.f32 %v688_v33, %v376_v38 }
 0x1a4   : > { %v690_v41 = vpop.eup %689 }
 0x1a5   : > { %v359_v43 = vmul.f32 %v690_v41, %v354_v35  ;;  %v381_v44 = vsel %vm380_vm4, %v688_v33, %v377_v40  ;;  %vm364_vm6 = vweird.f32 %v690_v41 }
 0x1a6   : > { %v386_v45 = vsel %vm383_vm5, %v385_v42, %v381_v44  ;;  %vm365_vm8 = vmor %vm363_vm7, %vm364_vm6 }
 0x1a7   : > { %v360_v47 = vsub.f32 1.0, %v359_v43  ;;  %v387_v48 = vmul.f32 %v684_v27, %v386_v45 }
 0x1a9   : > { %v361_v50 = vmul.f32 %v690_v41, %v360_v47  ;;  %v390_v52 = vmul.f32 %v388_v46, %v387_v48 }
 0x1ab   : > { %v362_v53 = vadd.f32 %v690_v41, %v361_v50  ;;  %411 = vmatpush.msra.mxu1 %v390_v52  ;;  %670 = vmatpush.msra.mxu3 %v390_v52 }
 0x1ad   : > { %v366_v55 = vsel %vm365_vm8, %v690_v41, %v362_v53 }
 0x1ae   : > { %v371_v56 = vsel %vm368_vm9, %v370_v54, %v366_v55 }
 0x1af   : > { %v372_v57 = vmul.f32 %v686_v30, %v371_v56 }
 0x1b1   : > { %v389_v58 = vmul.f32 %v388_v46, %v372_v57 }
 0x1b3   : > { %412 = vmatpush.msra.mxu1 %v389_v58  ;;  %671 = vmatpush.msra.mxu3 %v389_v58 }
 0x1b4   : > { %655 = vmatmul.msk.f32.vlgmr.msra.gmra.mxu3 %vm310_vm1, %v768_v1  ;;  %654 = vmatmul.msk.f32.vlgmr.msra.gmra.mxu1 %vm310_vm1, %v763_v0 }
 0x231   : > { %v414_v59 = vpop.f32.mrf.mxu1 }
 0x232   : > { %v420_v60 = vadd.f32 %v414_v59, %v787_v6 }
 0x234   : > { %422 = vst.msk [vmem:[#allocation2] sm:$0xff] %vm310_vm1, %v420_v60 }
 0x237   : > { %v417_v61 = vpop.f32.mrf.mxu3 }
 0x238   : > { %v421_v62 = vadd.f32 %v417_v61, %v805_v10 }
 0x23a   : > { %423 = vst.msk [vmem:[#allocation2 + $0x8] sm:$0xff] %vm310_vm1, %v421_v62 }
 0x23b PF: > { %457 = vmatpush.msra.mxu0 %v842_v17  ;;  %v424_v63 = vld [vmem:[#allocation2] sm:$0xff]  ;;  %vm436_vm10 = vcmask 130048   ;;  %v706_v2 = vmov 0  }
 0x23c   : > { %691 = vset.pattern.permute.xlu0 %v706_v2  ;;  %692 = vset.pattern.permute.xlu1 %v706_v2 }
 0x23d   : > { %458 = vmatpush.msra.mxu0 %v840_v16  ;;  %433 = vperm.xlu0 %691, %v784_v5  }
 0x23e   : > { %656 = vmatmul.msk.f32.vlgmr.msra.gmra.mxu0 %vm436_vm10, %v424_v63  ;;  %511 = vperm.xlu1 %692, %v815_v12  }
 0x23f   : > { %693 = vset.pattern.permute.xlu2 %v706_v2 }
 0x240   : > { %521 = vperm.xlu2 %693, %v825_v14  }
 0x241   : > { %v425_v0 = vld [vmem:[#allocation2 + $0x8] sm:$0xff] }
 0x245   : > { %428 = vperm.xlu0 %691, %v779_v4  }
 0x246   : > { %657 = vmatmul.msk.f32.gmra.mxu0 %vm436_vm10, %v425_v0  ;;  %516 = vperm.xlu1 %692, %v820_v13  }
 0x248   : > { %526 = vperm.xlu2 %693, %v830_v15  }
 0x2af   : > { %v434_v1 = vpop.permute.xlu0 %433 }
 0x2b7   : > { %v429_v3 = vpop.permute.xlu0 %428 }
 0x2bb   : > { %v460_v6 = vpop.f32.mrf.mxu0 }
 0x2bc   : > { %v461_v5 = vadd.f32 %v460_v6, %v429_v3 }
 0x2be   : > { %v466_v10 = vmul.f32 0.5, %v461_v5 }
 0x2c0   : > { %694 = vtanh.f32 %v466_v10 }
 0x2c3   : > { %v463_v18 = vpop.f32.mrf.mxu0 }
 0x2c4   : > { %v464_v19 = vadd.f32 %v463_v18, %v434_v1 }
 0x2c6   : > { %v467_v12 = vmul.f32 0.5, %v464_v19  ;;  %v695_v14 = vpop.eup %694 }
 0x2c7   : > { %v470_v4 = vmul.f32 0.5, %v695_v14 }
 0x2c8   : > { %696 = vtanh.f32 %v467_v12 }
 0x2c9   : > { %v472_v23 = vadd.f32 0.5, %v470_v4 }
 0x2ce   : > { %v697_v20 = vpop.eup %696 }
 0x2cf   : > { %v471_v21 = vmul.f32 0.5, %v697_v20 }
 0x2d1   : > { %v473_v22 = vadd.f32 0.5, %v471_v21 }
 0x2d3   : > { %494 = vmatpush.msra.mxu1 %v473_v22 }
 0x2d5   : > { %495 = vmatpush.msra.mxu1 %v472_v23 }
 0x2d6   : > { %658 = vmatmul.msk.f32.vlgmr.msra.gmra.mxu1 %vm436_vm10, %v840_v16  ;;  %v522_v16 = vpop.permute.xlu2 %521 }
 0x2de   : > { %659 = vmatmul.msk.f32.gmra.mxu1 %vm436_vm10, %v842_v17  ;;  %v512_v17 = vpop.permute.xlu1 %511 }
 0x2e6   : > { %v517_v34 = vpop.permute.xlu1 %516 }
 0x353   : > { %v497_v13 = vpop.f32.mrf.mxu1 }
 0x354   : > { %v505_v24 = vmul.f32 0.2, %v497_v13  ;;  %vm503_vm12 = vcmp.ge.f32.partialorder %v497_v13, 0.0 }
 0x356   : > { %v507_v27 = vsel %vm503_vm12, %v497_v13, %v505_v24 }
 0x35b   : > { %v500_v15 = vpop.f32.mrf.mxu1 }
 0x35c   : > { %vm504_vm11 = vcmp.ge.f32.partialorder %v500_v15, 0.0  ;;  %v506_v25 = vmul.f32 0.2, %v500_v15 }
 0x35e   : > { %v508_v26 = vsel %vm504_vm11, %v500_v15, %v506_v25 }
 0x35f   : > { %555 = vmatpush.msra.mxu2 %v508_v26  ;;  %672 = vmatpush.msra.mxu3 %v508_v26 }
 0x361   : > { %556 = vmatpush.msra.mxu2 %v507_v27  ;;  %673 = vmatpush.msra.mxu3 %v507_v27 }
 0x362   : > { %660 = vmatmul.msk.f32.vlgmr.msra.gmra.mxu2 %vm436_vm10, %v792_v7  ;;  %662 = vmatmul.msk.f32.vlgmr.msra.gmra.mxu3 %vm436_vm10, %v802_v9 }
 0x36a   : > { %661 = vmatmul.msk.f32.gmra.mxu2 %vm436_vm10, %v797_v8  ;;  %663 = vmatmul.msk.f32.gmra.mxu3 %vm436_vm10, %v810_v11  ;;  %v527_v8 = vpop.permute.xlu2 %526 }
 0x3e5   : > { %v558_v28 = vpop.f32.mrf.mxu2  ;;  %v564_v29 = vpop.f32.mrf.mxu3 }
 0x3e6   : > { %v559_v30 = vadd.f32 %v558_v28, %v512_v17  ;;  %v565_v31 = vadd.f32 %v564_v29, %v522_v16 }
 0x3e8   : > { %vm570_vm13 = vcmp.ge.f32.partialorder %v559_v30, 0.0  ;;  %v574_v32 = vmul.f32 0.2, %v559_v30  ;;  %vm572_vm14 = vcmp.ge.f32.partialorder %v565_v31, 0.0  ;;  %v576_v7 = vmul.f32 0.2, %v565_v31 }
 0x3ea   : > { %v578_v33 = vsel %vm570_vm13, %v559_v30, %v574_v32  ;;  %v580_v9 = vsel %vm572_vm14, %v565_v31, %v576_v7 }
 0x3eb   : > { %582 = vst.msk [vmem:[%s838_s19] sm:$0xff] %vm436_vm10, %v578_v33 }
 0x3ec   : > { %584 = vst.msk [vmem:[%s838_s19 + $0x10] sm:$0xff] %vm436_vm10, %v580_v9 }
 0x3ed   : > { %v561_v11 = vpop.f32.mrf.mxu2  ;;  %v567_v35 = vpop.f32.mrf.mxu3 }
 0x3ee   : > { %v562_v36 = vadd.f32 %v561_v11, %v517_v34  ;;  %v568_v37 = vadd.f32 %v567_v35, %v527_v8 }
 0x3f0   : > { %vm571_vm15 = vcmp.ge.f32.partialorder %v562_v36, 0.0  ;;  %v575_v38 = vmul.f32 0.2, %v562_v36  ;;  %vm573_vm0 = vcmp.ge.f32.partialorder %v568_v37, 0.0  ;;  %v577_v39 = vmul.f32 0.2, %v568_v37 }
 0x3f2   : > { %v579_v40 = vsel %vm571_vm15, %v562_v36, %v575_v38  ;;  %v581_v41 = vsel %vm573_vm0, %v568_v37, %v577_v39 }
 0x3f3   : > { %583 = vst.msk [vmem:[%s838_s19 + $0x8] sm:$0xff] %vm436_vm10, %v579_v40 }
 0x3f4   : > { %585 = vst.msk [vmem:[%s838_s19 + $0x18] sm:$0xff] %vm436_vm10, %v581_v41 }
 0x3f5 PF: > { %s18_s26 = sadd.s32 1, %s704_s26  }
 0x3f6   : > { %p15_p6 = scmp.ge.s32.totalorder %s18_s26, 4  }
 0x3f8   :  { %17 = sbr.rel (!%p15_p6) target bundleno = 2 (0x2), region = 86 }

</bundles_post_ra>
